<compile_context>
chip_gen: v6e
topology: v6e:2x2x1
jax: 0.10.0
libtpu: 0.0.40
codegen_flags: <defaults>
</compile_context>

<pallas_src>
import functools

import jax
import jax.numpy as jnp
from jax.experimental import pallas as pl
from jax.experimental.pallas import tpu as pltpu

_LANE = 128
_SUBLANE = 8
_VAR_EPS = 1e-30      # guards rsqrt against zero / cancellation-negative variance
_MAX_TILE_B = 2048    # per-step overhead fully amortized well before this
_MAX_TILE_H = 1024


# --------------------------------------------------------------------------- kernels
def _sigmoid(z):
    # One EUP push (tanh) instead of exp + divide.
    return 0.5 * jnp.tanh(0.5 * z) + 0.5


def _dice_onepass_kernel(x_ref, alpha_ref, o_ref):
    """Whole batch resident per column tile: stats + gating in one pass."""
    x = x_ref[...].astype(jnp.float32)                    # (B, TH)
    b = x.shape[0]
    scale = 1.0 / (b - 1) if b > 1 else float("nan")      # unbiased (torch.std default)
    mean = jnp.mean(x, axis=0, keepdims=True)             # (1, TH)  XLU reduce
    diff = x - mean
    var = jnp.sum(diff * diff, axis=0, keepdims=True) * scale
    inv_std = jax.lax.rsqrt(jnp.maximum(var, _VAR_EPS))   # one EUP op / column
    p = _sigmoid(diff * inv_std)
    alpha = alpha_ref[0]                                  # scalar from SMEM
    # x*p + alpha*x*(1-p)  ==  x * (alpha + (1-alpha)*p)
    o_ref[...] = (x * (alpha + (1.0 - alpha) * p)).astype(o_ref.dtype)


def _dice_stats_kernel(x_ref, mean_ref, rstd_ref, sum_ref, sumsq_ref, *, total_b):
    """Pass 1 (batch-gridded path): accumulate per-column sum / sum-of-squares over
    batch tiles in VMEM scratch rows; finalize to (mean, 1/std) on the last tile."""
    i = pl.program_id(1)                                  # batch-tile index (reduction)

    @pl.when(i == 0)
    def _init():
        sum_ref[...] = jnp.zeros_like(sum_ref)
        sumsq_ref[...] = jnp.zeros_like(sumsq_ref)

    x = x_ref[...].astype(jnp.float32)                    # (TB, TH)
    tb = x.shape[0]
    row = i * tb + jax.lax.broadcasted_iota(jnp.int32, x.shape, 0)
    xm = jnp.where(row < total_b, x, 0.0)                 # mask ragged last batch tile
    # Direct row accumulation (no per-step concatenate / layout ops).  The column
    # reductions could also be pushed onto the idle MXU via a (1,TB)x(TB,TH)
    # ones-matmul, but this pass is HBM-bound so the XLU reduce is kept.
    sum_ref[...] += jnp.sum(xm, axis=0, keepdims=True)
    sumsq_ref[...] += jnp.sum(xm * xm, axis=0, keepdims=True)

    @pl.when(i == pl.num_programs(1) - 1)
    def _finalize():
        n = float(total_b)
        scale = 1.0 / (total_b - 1) if total_b > 1 else float("nan")
        mean = sum_ref[...] * (1.0 / n)
        var = (sumsq_ref[...] - n * (mean * mean)) * scale
        mean_ref[...] = mean
        # Clamp: E[x^2]-E[x]^2 cancellation can go slightly negative in f32;
        # rsqrt(negative) would otherwise poison whole output columns with NaN.
        rstd_ref[...] = jax.lax.rsqrt(jnp.maximum(var, _VAR_EPS))


def _dice_apply_kernel(x_ref, mean_ref, rstd_ref, alpha_ref, o_ref):
    """Pass 2 (batch-gridded path): pure elementwise gating with precomputed stats."""
    x = x_ref[...].astype(jnp.float32)
    p = _sigmoid((x - mean_ref[...]) * rstd_ref[...])
    alpha = alpha_ref[0]
    o_ref[...] = (x * (alpha + (1.0 - alpha) * p)).astype(o_ref.dtype)


# ------------------------------------------------------------------------- launchers
def _round_down(v, m):
    return (v // m) * m


def _vmem_budget():
    """Generation-aware scoped-VMEM limit plus a tile budget that also accounts for
    in-kernel full-tile temporaries (f32 upcast / gate), not just the I/O blocks."""
    try:
        cap = int(getattr(pltpu.get_tpu_info(), "vmem_capacity_bytes"))
    except Exception:
        cap = 64 << 20                        # conservative: v7x per-TensorCore VMEM
    # Always set the scoped limit explicitly (v5e's default is only 16 MiB):
    # 64 MiB on v5e/v6e (128 MiB physical), 48 MiB on v7x (64 MiB physical).
    vmem_limit = max(min(cap - (16 << 20), 64 << 20), 32 << 20)
    budget = vmem_limit // 2                  # I/O blocks + temporaries <= half the limit
    return budget, vmem_limit


def _dice_one_pass(x, alpha, tile_h, vmem_limit):
    B, H = x.shape
    return pl.pallas_call(
        _dice_onepass_kernel,
        out_shape=jax.ShapeDtypeStruct((B, H), x.dtype),
        grid_spec=pltpu.PrefetchScalarGridSpec(
            num_scalar_prefetch=0,
            grid=(pl.cdiv(H, tile_h),),
            in_specs=[
                pl.BlockSpec((B, tile_h), lambda j: (0, j)),          # x column tile
                pl.BlockSpec(memory_space=pltpu.MemorySpace.SMEM),    # alpha scalar
            ],
            out_specs=pl.BlockSpec((B, tile_h), lambda j: (0, j)),
        ),
        compiler_params=pltpu.CompilerParams(
            dimension_semantics=("parallel",),
            vmem_limit_bytes=vmem_limit),
    )(x, alpha)


def _dice_two_pass(x, alpha, tile_h, tile_b, vmem_limit):
    B, H = x.shape
    n_h = pl.cdiv(H, tile_h)
    n_b = pl.cdiv(B, tile_b)

    # Pass 1: per-column (mean, 1/std); batch axis is the (last) reduction axis.
    mean, rstd = pl.pallas_call(
        functools.partial(_dice_stats_kernel, total_b=B),
        out_shape=(jax.ShapeDtypeStruct((1, H), jnp.float32),
                   jax.ShapeDtypeStruct((1, H), jnp.float32)),
        grid_spec=pltpu.PrefetchScalarGridSpec(
            num_scalar_prefetch=0,
            grid=(n_h, n_b),
            in_specs=[pl.BlockSpec((tile_b, tile_h), lambda j, i: (i, j))],
            out_specs=[pl.BlockSpec((1, tile_h), lambda j, i: (0, j)),
                       pl.BlockSpec((1, tile_h), lambda j, i: (0, j))],
            scratch_shapes=[pltpu.VMEM((1, tile_h), jnp.float32),
                            pltpu.VMEM((1, tile_h), jnp.float32)],
        ),
        compiler_params=pltpu.CompilerParams(
            dimension_semantics=("parallel", "arbitrary"),
            vmem_limit_bytes=vmem_limit),
    )(x)

    # Pass 2: elementwise gating streamed over (batch, feature) tiles.  Batch is the
    # outer parallel axis (many tiles -> v7x megacore sharding even when n_h == 1);
    # the tiny (1, tile_h) stats blocks are re-fetched per step (<1% of the x DMA).
    return pl.pallas_call(
        _dice_apply_kernel,
        out_shape=jax.ShapeDtypeStruct((B, H), x.dtype),
        grid_spec=pltpu.PrefetchScalarGridSpec(
            num_scalar_prefetch=0,
            grid=(n_b, n_h),
            in_specs=[
                pl.BlockSpec((tile_b, tile_h), lambda i, j: (i, j)),
                pl.BlockSpec((1, tile_h), lambda i, j: (0, j)),
                pl.BlockSpec((1, tile_h), lambda i, j: (0, j)),
                pl.BlockSpec(memory_space=pltpu.MemorySpace.SMEM),
            ],
            out_specs=pl.BlockSpec((tile_b, tile_h), lambda i, j: (i, j)),
        ),
        compiler_params=pltpu.CompilerParams(
            dimension_semantics=("parallel", "parallel"),
            vmem_limit_bytes=vmem_limit),
    )(x, mean, rstd, alpha)


def dice_forward(x, alpha, *, tile_h=None, tile_b=None, force_two_pass=False):
    """Dice activation.  x: (B, H) float32 or bfloat16, alpha: scalar / (1,) parameter."""
    B, H = x.shape
    isz = jnp.dtype(x.dtype).itemsize
    alpha = jnp.asarray(alpha, jnp.float32).reshape((1,))
    budget, vmem_limit = _vmem_budget()

    # Per-element VMEM cost of a streamed tile: double-buffered in + out blocks plus
    # ~2 full-tile f32 temporaries materialized inside the kernel body.
    bytes_per_elem = 4 * isz + 8

    # ---- one-pass candidate: whole batch resident per column tile -----------------
    bytes_per_col = B * bytes_per_elem
    max_cols = budget // max(bytes_per_col, 1)
    one_tile_h = H if H <= max_cols else min(_round_down(max_cols, _LANE), _MAX_TILE_H)
    one_pass_fits = one_tile_h >= min(H, _LANE)
    n_h_one = pl.cdiv(H, one_tile_h) if one_pass_fits else 0

    # Path choice: for DIN widths (H = 80 / 200) a column-tiled one-pass collapses to a
    # 1-step grid (no DMA/compute overlap, one idle TC on v7x), so the default grids
    # over the batch (two-pass).  One-pass is kept only where it actually pipelines
    # (>= 4 column tiles) or when the batch is too small to split (tiny data anyway).
    small_batch = B < 2 * _SUBLANE
    use_one_pass = (not force_two_pass) and one_pass_fits and (small_batch or n_h_one >= 4)

    if use_one_pass:
        th = min(tile_h, H) if tile_h is not None else one_tile_h
        return _dice_one_pass(x, alpha, th, vmem_limit)

    # ---- two-pass: stats reduction over batch tiles, then streamed gating ---------
    if tile_h is not None:
        th = min(tile_h, H)
    else:
        # Full-H (or 512-lane) tiles keep the only masked-lane store region to the
        # single ragged tail of H.
        th = H if H <= 4 * _LANE else 4 * _LANE
    if tile_b is not None:
        tb = min(tile_b, B)
        if tb < B:
            tb = max(_round_down(tb, _SUBLANE), _SUBLANE)
    else:
        tb = budget // max(th * bytes_per_elem, 1)
        tb = min(tb, _MAX_TILE_B)
        # keep >= ~4 batch tiles so the pipeline overlaps and both v7x cores get work
        tb = min(tb, max(_round_down(pl.cdiv(B, 4), _SUBLANE), _SUBLANE))
        tb = max(_round_down(tb, _SUBLANE), _SUBLANE)
    return _dice_two_pass(x, alpha, th, tb, vmem_limit)


def dice_reference(x, alpha):
    x = x.astype(jnp.float32)
    mean = jnp.mean(x, axis=0)
    std = jnp.std(x, axis=0, ddof=1)                       # unbiased, matches torch.std
    p = jax.nn.sigmoid((x - mean) / std)
    a = jnp.asarray(alpha, jnp.float32).reshape((1,))[0]
    return x * p + a * x * (1.0 - p)


if __name__ == "__main__":
    key = jax.random.PRNGKey(0)
    k1, k2, k3, k4 = jax.random.split(key, 4)

    # Case 1: DIN first hidden width (units=[200, 80, 2]), tiny batch -> one-pass path;
    # alpha initialized to zeros exactly like the nn.Parameter.
    B, H = 8, 200
    x = jax.random.normal(k1, (B, H), dtype=jnp.float32)
    alpha = jnp.zeros((1,), dtype=jnp.float32)
    out = jax.block_until_ready(dice_forward(x, alpha))
    assert out.shape == x.shape and out.dtype == x.dtype
    assert jnp.allclose(out, dice_reference(x, alpha), atol=1e-5, rtol=1e-5)

    # Case 2: DIN-sized H (80) with a batch large enough to grid over B (default
    # two-pass path, auto tiles), nonzero alpha.
    B2, H2 = 256, 80
    x2 = jax.random.normal(k2, (B2, H2), dtype=jnp.float32)
    alpha2 = jnp.full((1,), 0.25, dtype=jnp.float32)
    out2 = jax.block_until_ready(dice_forward(x2, alpha2))
    assert jnp.allclose(out2, dice_reference(x2, alpha2), atol=1e-4, rtol=1e-4)

    # Case 3: forced two-pass with explicit tiles and a ragged last batch tile
    # (100 % 32 != 0) plus a ragged last column tile (256 / 128 exact, 2 H tiles).
    B3, H3 = 100, 256
    x3 = jax.random.normal(k3, (B3, H3), dtype=jnp.float32)
    alpha3 = jnp.zeros((1,), dtype=jnp.float32)
    out3 = jax.block_until_ready(
        dice_forward(x3, alpha3, force_two_pass=True, tile_b=32, tile_h=128))
    assert jnp.allclose(out3, dice_reference(x3, alpha3), atol=1e-4, rtol=1e-4)

    # Case 4: bf16 I/O path (halved HBM traffic; math in f32 inside the kernels).
    B4, H4 = 128, 200
    x4 = jax.random.normal(k4, (B4, H4), dtype=jnp.float32).astype(jnp.bfloat16)
    alpha4 = jnp.zeros((1,), dtype=jnp.float32)
    out4 = jax.block_until_ready(dice_forward(x4, alpha4))
    assert out4.dtype == jnp.bfloat16
    ref4 = dice_reference(x4.astype(jnp.float32), alpha4)
    assert jnp.allclose(out4.astype(jnp.float32), ref4, atol=5e-2, rtol=5e-2)

    print("KERNEL_OK")
</pallas_src>

<mosaic_0001>
module attributes {stable_mosaic.version = 11 : i64} {
  func.func @_dice_onepass_kernel(%arg0: i32, %arg1: memref<8x200xf32, #tpu.memory_space<vmem>>, %arg2: memref<1xf32, #tpu.memory_space<smem>>, %arg3: memref<8x200xf32, #tpu.memory_space<vmem>>) attributes {dimension_semantics = [#tpu.dimension_semantics<parallel>], iteration_bounds = array<i64: 1>, scalar_prefetch = 0 : i64, scratch_operands = 0 : i64, tpu.core_type = #tpu.core_type<tc>, window_params = [{transform_indices = @transform_0, window_bounds = array<i64: 8, 200>}, {transform_indices = @transform_1, window_bounds = array<i64: 1>}, {transform_indices = @transform_2, window_bounds = array<i64: 8, 200>}]} {
    %c0 = arith.constant 0 : index
    %c0_0 = arith.constant 0 : index
    %0 = vector.load %arg1[%c0, %c0_0] : memref<8x200xf32, #tpu.memory_space<vmem>>, vector<8x200xf32>
    %cst = arith.constant dense<0.000000e+00> : vector<200xf32>
    %1 = vector.multi_reduction <add>, %0, %cst [0] : vector<8x200xf32> to vector<200xf32>
    %2 = vector.shape_cast %1 : vector<200xf32> to vector<1x200xf32>
    %cst_1 = arith.constant 8.000000e+00 : f32
    %3 = vector.broadcast %cst_1 : f32 to vector<1x200xf32>
    %4 = arith.divf %2, %3 : vector<1x200xf32>
    %5 = vector.broadcast %4 : vector<1x200xf32> to vector<8x200xf32>
    %6 = arith.subf %0, %5 : vector<8x200xf32>
    %7 = arith.mulf %6, %6 : vector<8x200xf32>
    %cst_2 = arith.constant dense<0.000000e+00> : vector<200xf32>
    %8 = vector.multi_reduction <add>, %7, %cst_2 [0] : vector<8x200xf32> to vector<200xf32>
    %9 = vector.shape_cast %8 : vector<200xf32> to vector<1x200xf32>
    %cst_3 = arith.constant 0.142857149 : f32
    %10 = vector.broadcast %cst_3 : f32 to vector<1x200xf32>
    %11 = arith.mulf %9, %10 : vector<1x200xf32>
    %cst_4 = arith.constant 1.000000e-30 : f32
    %12 = vector.broadcast %cst_4 : f32 to vector<1x200xf32>
    %13 = arith.maximumf %11, %12 : vector<1x200xf32>
    %14 = math.rsqrt %13 : vector<1x200xf32>
    %15 = vector.broadcast %14 : vector<1x200xf32> to vector<8x200xf32>
    %16 = arith.mulf %6, %15 : vector<8x200xf32>
    %cst_5 = arith.constant 5.000000e-01 : f32
    %17 = vector.broadcast %cst_5 : f32 to vector<8x200xf32>
    %18 = arith.mulf %17, %16 : vector<8x200xf32>
    %19 = math.tanh %18 : vector<8x200xf32>
    %cst_6 = arith.constant 5.000000e-01 : f32
    %20 = vector.broadcast %cst_6 : f32 to vector<8x200xf32>
    %21 = arith.mulf %20, %19 : vector<8x200xf32>
    %cst_7 = arith.constant 5.000000e-01 : f32
    %22 = vector.broadcast %cst_7 : f32 to vector<8x200xf32>
    %23 = arith.addf %21, %22 : vector<8x200xf32>
    %c0_8 = arith.constant 0 : index
    %24 = memref.load %arg2[%c0_8] : memref<1xf32, #tpu.memory_space<smem>>
    %cst_9 = arith.constant 1.000000e+00 : f32
    %25 = arith.subf %cst_9, %24 : f32
    %26 = vector.broadcast %25 : f32 to vector<8x200xf32>
    %27 = arith.mulf %26, %23 : vector<8x200xf32>
    %28 = vector.broadcast %24 : f32 to vector<8x200xf32>
    %29 = arith.addf %28, %27 : vector<8x200xf32>
    %30 = arith.mulf %0, %29 : vector<8x200xf32>
    %c0_10 = arith.constant 0 : index
    %c0_11 = arith.constant 0 : index
    %31 = vector.load %arg3[%c0_10, %c0_11] : memref<8x200xf32, #tpu.memory_space<vmem>>, vector<8x200xf32>
    tpu.vector_store %arg3[%c0_10, %c0_11], %30 {strides = array<i32>} : memref<8x200xf32, #tpu.memory_space<vmem>>, vector<8x200xf32>,
    return
  }
  func.func @transform_0(%arg0: i32) -> (i32, i32) {
    %c0_i32 = arith.constant 0 : i32
    %c0_i32_0 = arith.constant 0 : i32
    return %c0_i32, %arg0 : i32, i32
  }
  func.func @transform_1(%arg0: i32) -> i32 {
    %c0_i32 = arith.constant 0 : i32
    %c0_i32_0 = arith.constant 0 : i32
    return %c0_i32 : i32
  }
  func.func @transform_2(%arg0: i32) -> (i32, i32) {
    %c0_i32 = arith.constant 0 : i32
    %c0_i32_0 = arith.constant 0 : i32
    return %c0_i32, %arg0 : i32, i32
  }
}

</mosaic_0001>

<bundles_post_ra>
// kernel: tpu_custom_call.1
= control target key start
LH: loop header
LB: loop body
LE: loop exit
PB: predicated region body
PF: predicated region fallthrough
CT: control target
= control target key end

     0   :  { %8 = vsyncpa [#allocation4], 0  ;;  %s195_s0 = inlined_call_operand.hbm [shape: f32[8,200], index: 0, kind: input, shape index: {}]   ;;  %s196_s1 = inlined_call_operand.<no memory space> [shape: f32[1], index: 1, kind: input, shape index: {}]   ;;  %s197_s2 = inlined_call_operand.hbm [shape: f32[8,200], index: 2, kind: output, shape index: {}]  }
   0x1   :  { %9 = vsyncpa [#allocation5], 0  ;;  %s158_s9 = smov [#allocation3]  }
   0x2   :  { %s16_s10 = sshll.u32 %s158_s9, 4  ;;  %s17_s10 = int_to_ptr.vmem [resolvable:$true] %s16_s10 }
   0x3   :  { %s122_s11 = scalar_lea.vmem %s17_s10, 256  ;;  %p127_p1 = scmp.lt.s32.totalorder %s17_s10, %s17_s10 }
   0x4   :  { %p123_p0 = scmp.ne.s32.totalorder %s17_s10, %s122_s11  ;;  %p128_p2 = scmp.lt.s32.totalorder %s122_s11, %s122_s11 }
   0x6   :  { %p129_p3 = por %p128_p2, %p127_p1 }
   0x8   :  { %p130_p4 = pnand %p129_p3, %p123_p0 }
   0xa   :  { %133 = shalt.err (!%p130_p4)
}
   0xb   :  { %19 = dma.hbm_to_vmem [thread:$0]  %s195_s0, 256, %s17_s10, [#allocation4]  }
   0xc   :  { %154 = dma.done.wait [#allocation4], 256  }
   0xd   :  { %155 = vsyncadd [#allocation4], 4294967040  ;;  %vm33_vm0 = vcmask 588800   ;;  %v25_v0 = vld [vmem:[#allocation3] sm:$0xff]  ;;  %v178_v1 = vld [vmem:[#allocation3 + $0x8] sm:$0xff]  ;;  %s78_s15 = ssub.f32 1.0, %s196_s1  ;;  %v82_v50 = vstv %s196_s1 }
   0xe   :  { %v27_v2 = vrot.slane %v25_v0, 4  ;;  %v34_v3 = vsel %vm33_vm0, %v178_v1, 0.0  ;;  %s159_s18 = smov [#allocation6]  }
   0xf   :  { %v35_v4 = vrot.slane %v34_v3, 4  ;;  %v79_v47 = vstv %s78_s15  ;;  %s95_s19 = sshll.u32 %s159_s18, 4  ;;  %s96_s19 = int_to_ptr.vmem [resolvable:$true] %s95_s19 }
  0x10   :  { %v28_v5 = vadd.f32 %v27_v2, %v25_v0  ;;  %s134_s20 = scalar_lea.vmem %s96_s19, 256  ;;  %p139_p6 = scmp.lt.s32.totalorder %s96_s19, %s96_s19 }
  0x11   :  { %v36_v6 = vadd.f32 %v35_v4, %v34_v3  ;;  %p135_p5 = scmp.ne.s32.totalorder %s96_s19, %s134_s20  ;;  %p140_p7 = scmp.lt.s32.totalorder %s134_s20, %s134_s20 }
  0x12   :  { %v29_v7 = vrot.slane %v28_v5, 2 }
  0x13   :  { %v37_v8 = vrot.slane %v36_v6, 2  ;;  %p141_p8 = por %p140_p7, %p139_p6 }
  0x14   :  { %v30_v9 = vadd.f32 %v29_v7, %v28_v5 }
  0x15   :  { %v38_v10 = vadd.f32 %v37_v8, %v36_v6  ;;  %p142_p9 = pnand %p141_p8, %p135_p5 }
  0x16   :  { %v31_v11 = vrot.slane %v30_v9, 1 }
  0x17   :  { %v39_v12 = vrot.slane %v38_v10, 1 }
  0x18   :  { %v32_v13 = vadd.f32 %v31_v11, %v30_v9 }
  0x19   :  { %v40_v14 = vadd.f32 %v39_v12, %v38_v10 }
  0x1a   :  { %v42_v15 = vmul.f32 0.125, %v32_v13 }
  0x1b   :  { %v43_v16 = vmul.f32 0.125, %v40_v14 }
  0x1c   :  { %v44_v17 = vsub.f32 %v25_v0, %v42_v15 }
  0x1d   :  { %v45_v18 = vsub.f32 %v178_v1, %v43_v16 }
  0x1e   :  { %v46_v19 = vmul.f32 %v44_v17, %v44_v17 }
  0x1f   :  { %v47_v20 = vmul.f32 %v45_v18, %v45_v18 }
  0x20   :  { %v48_v21 = vrot.slane %v46_v19, 4 }
  0x21   :  { %v54_v22 = vsel %vm33_vm0, %v47_v20, 0.0 }
  0x22   :  { %v49_v23 = vadd.f32 %v48_v21, %v46_v19  ;;  %v55_v24 = vrot.slane %v54_v22, 4 }
  0x24   :  { %v50_v25 = vrot.slane %v49_v23, 2  ;;  %v56_v26 = vadd.f32 %v55_v24, %v54_v22 }
  0x26   :  { %v51_v27 = vadd.f32 %v50_v25, %v49_v23  ;;  %v57_v28 = vrot.slane %v56_v26, 2 }
  0x28   :  { %v52_v29 = vrot.slane %v51_v27, 1  ;;  %v58_v30 = vadd.f32 %v57_v28, %v56_v26 }
  0x2a   :  { %v53_v31 = vadd.f32 %v52_v29, %v51_v27  ;;  %v59_v32 = vrot.slane %v58_v30, 1 }
  0x2c   :  { %v61_v33 = vmul.f32 0.14285715, %v53_v31  ;;  %v60_v34 = vadd.f32 %v59_v32, %v58_v30 }
  0x2e   :  { %v63_v35 = vmax.f32 %v61_v33, 1e-30  ;;  %v62_v36 = vmul.f32 0.14285715, %v60_v34 }
  0x30   :  { %106 = vrsqrt.f32 %v63_v35  ;;  %v64_v37 = vmax.f32 %v62_v36, 1e-30 }
  0x32   :  { %108 = vrsqrt.f32 %v64_v37 }
  0x3d   :  { %v107_v38 = vpop.eup %106 }
  0x3e   :  { %v67_v39 = vmul.f32 %v107_v38, %v44_v17 }
  0x3f   :  { %v109_v40 = vpop.eup %108 }
  0x40   :  { %v69_v41 = vmul.f32 0.5, %v67_v39  ;;  %v68_v42 = vmul.f32 %v109_v40, %v45_v18 }
  0x42   :  { %110 = vtanh.f32 %v69_v41  ;;  %v70_v43 = vmul.f32 0.5, %v68_v42 }
  0x44   :  { %112 = vtanh.f32 %v70_v43 }
  0x4f   :  { %v111_v44 = vpop.eup %110 }
  0x50   :  { %v73_v45 = vmul.f32 0.5, %v111_v44 }
  0x51   :  { %v113_v46 = vpop.eup %112 }
  0x52   :  { %v75_v48 = vadd.f32 0.5, %v73_v45  ;;  %v74_v49 = vmul.f32 0.5, %v113_v46 }
  0x54   :  { %v80_v51 = vmul.f32 %v79_v47, %v75_v48  ;;  %v76_v52 = vadd.f32 0.5, %v74_v49 }
  0x56   :  { %v83_v53 = vadd.f32 %v82_v50, %v80_v51  ;;  %v81_v54 = vmul.f32 %v79_v47, %v76_v52 }
  0x58   :  { %v85_v55 = vmul.f32 %v83_v53, %v25_v0  ;;  %v84_v56 = vadd.f32 %v82_v50, %v81_v54 }
  0x5a   :  { %87 = vst [vmem:[#allocation6] sm:$0xff] %v85_v55  ;;  %v86_v57 = vmul.f32 %v84_v56, %v178_v1 }
  0x5c   :  { %88 = vst.msk [vmem:[#allocation6 + $0x8] sm:$0xff] %vm33_vm0, %v86_v57 }
  0x5d   :  { %145 = shalt.err (!%p142_p9)
}
  0x5e   :  { %98 = dma.vmem_to_hbm [thread:$0]  %s96_s19, 256, %s197_s2, [#allocation5]  }
  0x5f   :  { %156 = dma.done.wait [#allocation5], 256  }
  0x60   :  { %157 = vsyncadd [#allocation5], 4294967040 }
  0x61   :  { %102 = vsyncpa [#allocation4], 1 }
  0x62   :  { %103 = vsyncpa [#allocation5], 1 }

</bundles_post_ra>
